<compile_context>
chip_gen: v7x
topology: tpu7x:2x2x1
jax: 0.10.0
libtpu: 0.0.40
codegen_flags: <defaults>
</compile_context>

<pallas_src>
import jax
import jax.numpy as jnp
from jax.experimental import pallas as pl
from jax.experimental.pallas import tpu as pltpu

# --- module hyperparameters (mirrors credit_approval_ANN.py) ---
P = 15            # input features (credit-approval data: 15 features + label)
HIDDEN_DIM = 32   # config['hidden_dim']
BATCH = 8

TILE_B_MAX = 4096  # rows per grid step; large enough to amortize per-step
                   # overhead, small enough that lane-padded VMEM buffers
                   # (tile_b x 128 f32 for x/out blocks + matmul temps) stay
                   # well under the 32 MiB scoped-VMEM limit on every chip.


def _cdiv(a, b):
    return (a + b - 1) // b


def _round_up(n, m):
    return _cdiv(n, m) * m


def _choose_tile_b(batch):
    # Prefer >= 2 grid steps (v7x has 2 TensorCores; the "parallel" grid axis
    # shards across them), keep the sublane dim a multiple of 8, and cap the
    # tile so VMEM stays bounded.
    tile = _round_up(_cdiv(batch, 2), 8)
    return max(8, min(TILE_B_MAX, tile))


def _mlp_kernel(x_ref, w1_ref, b1_ref, w2_ref, b2_ref, o_ref):
    """sigmoid( relu(x @ W1 + b1) . w2 + b2 ), batch on the sublane axis.

    x_ref : (tile_b, P)       input tile (contiguous HBM read, no transpose)
    w1_ref: (P, HIDDEN)       l1 weight, grid-resident (constant index_map)
    b1_ref: (1, HIDDEN)       l1 bias, grid-resident (VPU broadcast add)
    w2_ref: (1, HIDDEN)       l2 weight row, grid-resident
    b2_ref: (1, 1)            l2 bias scalar in SMEM
    o_ref : (tile_b, 1)       output tile
    """
    # layer 1 on the MXU, f32 accumulation; bias add + ReLU on the VPU.
    h = jnp.dot(x_ref[...], w1_ref[...], preferred_element_type=jnp.float32)
    h = jnp.maximum(h + b1_ref[...], 0.0)                         # (tile_b, HIDDEN)
    # layer 2 (out_features == 1): VPU multiply + lane reduction (XLU slot is
    # otherwise idle in this HBM-bound kernel) -- no second MXU pass needed.
    logits = jnp.sum(h * w2_ref[...], axis=1, keepdims=True) + b2_ref[0, 0]
    o_ref[...] = jax.nn.sigmoid(logits)                           # (tile_b, 1)


def bayesian_network_forward(x, w1, b1, w2, b2):
    """Pallas implementation of BayesianNetwork.forward.

    x is flattened to (-1, P) like `x.view(-1, p)` in the PyTorch module and
    fed to the kernel in its natural (batch, P) layout: no concat / transpose /
    pad copies in the wrapper, the output already has shape (batch, 1), and
    uneven batches rely on Pallas' edge-block clipping.  Weights use constant
    index_maps, so they are fetched once and stay resident across the grid.
    Weights are stored transposed vs. PyTorch (w1: (P, HIDDEN), w2: (HIDDEN,1))
    so the math matches nn.Linear's y = x @ W.T + b.
    """
    x2d = x.reshape(-1, P).astype(jnp.float32)      # no-op for (batch, P) f32 input
    batch = x2d.shape[0]

    tile_b = _choose_tile_b(batch)
    num_tiles = _cdiv(batch, tile_b)

    w1_m = w1.reshape(P, HIDDEN_DIM).astype(jnp.float32)     # (P, HIDDEN)
    b1_r = b1.reshape(1, HIDDEN_DIM).astype(jnp.float32)     # (1, HIDDEN)
    w2_r = w2.reshape(1, HIDDEN_DIM).astype(jnp.float32)     # (1, HIDDEN)
    b2_s = b2.reshape(1, 1).astype(jnp.float32)              # (1, 1) -> SMEM

    flops = 2 * batch * P * HIDDEN_DIM + 3 * batch * HIDDEN_DIM
    bytes_accessed = batch * (P + 1) * 4 + (P + 2) * HIDDEN_DIM * 4 + 8

    out = pl.pallas_call(
        _mlp_kernel,
        out_shape=jax.ShapeDtypeStruct((batch, 1), jnp.float32),
        grid=(num_tiles,),
        in_specs=[
            pl.BlockSpec((tile_b, P), lambda i: (i, 0)),            # x tile (one HBM read)
            pl.BlockSpec((P, HIDDEN_DIM), lambda i: (0, 0)),        # resident l1 weight
            pl.BlockSpec((1, HIDDEN_DIM), lambda i: (0, 0)),        # resident l1 bias
            pl.BlockSpec((1, HIDDEN_DIM), lambda i: (0, 0)),        # resident l2 weight
            pl.BlockSpec(memory_space=pltpu.MemorySpace.SMEM),      # b2 scalar
        ],
        out_specs=pl.BlockSpec((tile_b, 1), lambda i: (i, 0)),
        compiler_params=pltpu.CompilerParams(
            dimension_semantics=("parallel",),      # batch tiles split across TCs (v7x)
            vmem_limit_bytes=32 * 1024 * 1024,      # lane-padded blocks need headroom
        ),
        cost_estimate=pl.CostEstimate(
            flops=int(flops),
            transcendentals=int(batch),
            bytes_accessed=int(bytes_accessed),
        ),
    )(x2d, w1_m, b1_r, w2_r, b2_s)

    return out                                                      # (batch, 1)


def init_params(key):
    """Deterministic init mimicking nn.Linear default (uniform +/- 1/sqrt(fan_in))."""
    k1, k2, k3, k4 = jax.random.split(key, 4)
    bound1 = 1.0 / jnp.sqrt(jnp.float32(P))
    bound2 = 1.0 / jnp.sqrt(jnp.float32(HIDDEN_DIM))
    w1 = jax.random.uniform(k1, (P, HIDDEN_DIM), jnp.float32, -bound1, bound1)
    b1 = jax.random.uniform(k2, (1, HIDDEN_DIM), jnp.float32, -bound1, bound1)
    w2 = jax.random.uniform(k3, (HIDDEN_DIM, 1), jnp.float32, -bound2, bound2)
    b2 = jax.random.uniform(k4, (1, 1), jnp.float32, -bound2, bound2)
    return w1, b1, w2, b2


def _reference(x, w1, b1, w2, b2):
    h = jnp.maximum(x.reshape(-1, P) @ w1 + b1, 0.0)
    return jax.nn.sigmoid(h @ w2 + b2)


if __name__ == "__main__":
    key = jax.random.PRNGKey(0)
    kx, kp, kx2, kx3 = jax.random.split(key, 4)
    w1, b1, w2, b2 = init_params(kp)

    # small batch (typical module usage): single tile, single grid step
    x = jax.random.normal(kx, (BATCH, P), jnp.float32)
    y = bayesian_network_forward(x, w1, b1, w2, b2)
    jax.block_until_ready(y)
    assert y.shape == (BATCH, 1)
    assert jnp.allclose(y, _reference(x, w1, b1, w2, b2), atol=1e-5, rtol=1e-5)

    # odd small batch: exercises a partial edge block at small scale
    x_odd = jax.random.normal(kx3, (13, P), jnp.float32)
    y_odd = bayesian_network_forward(x_odd, w1, b1, w2, b2)
    jax.block_until_ready(y_odd)
    assert y_odd.shape == (13, 1)
    assert jnp.allclose(y_odd, _reference(x_odd, w1, b1, w2, b2), atol=1e-5, rtol=1e-5)

    # larger batch: multi-tile grid with a partial last tile (no padding copies)
    big_batch = 3 * TILE_B_MAX + 37   # deliberately not a multiple of the tile size
    xb = jax.random.normal(kx2, (big_batch, P), jnp.float32)
    yb = bayesian_network_forward(xb, w1, b1, w2, b2)
    jax.block_until_ready(yb)
    assert yb.shape == (big_batch, 1)
    assert jnp.allclose(yb, _reference(xb, w1, b1, w2, b2), atol=1e-5, rtol=1e-5)

    # TODO(synk): nn.BCELoss (training loss) is not part of forward(); not implemented.
    print("KERNEL_OK")
</pallas_src>

<mosaic_0001>
module attributes {stable_mosaic.version = 11 : i64} {
  func.func @_mlp_kernel(%arg0: i32, %arg1: memref<8x15xf32, #tpu.memory_space<vmem>>, %arg2: memref<15x32xf32, #tpu.memory_space<vmem>>, %arg3: memref<1x32xf32, #tpu.memory_space<vmem>>, %arg4: memref<1x32xf32, #tpu.memory_space<vmem>>, %arg5: memref<1x1xf32, #tpu.memory_space<smem>>, %arg6: memref<8x1xf32, #tpu.memory_space<vmem>>) attributes {dimension_semantics = [#tpu.dimension_semantics<parallel>], iteration_bounds = array<i64: 1>, scalar_prefetch = 0 : i64, scratch_operands = 0 : i64, tpu.core_type = #tpu.core_type<tc>, window_params = [{transform_indices = @transform_0, window_bounds = array<i64: 8, 15>}, {pipeline_mode = #tpu.pipeline_mode<synchronous>, transform_indices = @transform_1, window_bounds = array<i64: 15, 32>}, {pipeline_mode = #tpu.pipeline_mode<synchronous>, transform_indices = @transform_2, window_bounds = array<i64: 1, 32>}, {pipeline_mode = #tpu.pipeline_mode<synchronous>, transform_indices = @transform_3, window_bounds = array<i64: 1, 32>}, {transform_indices = @transform_4, window_bounds = array<i64: 1, 1>}, {transform_indices = @transform_5, window_bounds = array<i64: 8, 1>}]} {
    %c0 = arith.constant 0 : index
    %c0_0 = arith.constant 0 : index
    %0 = vector.load %arg1[%c0, %c0_0] : memref<8x15xf32, #tpu.memory_space<vmem>>, vector<8x15xf32>
    %c0_1 = arith.constant 0 : index
    %c0_2 = arith.constant 0 : index
    %1 = vector.load %arg2[%c0_1, %c0_2] : memref<15x32xf32, #tpu.memory_space<vmem>>, vector<15x32xf32>
    %cst = arith.constant dense<0.000000e+00> : vector<8x32xf32>
    %2 = tpu.matmul %0, %1, %cst {dimension_numbers = #tpu.dot_dimension_numbers<[1], [0], [0], [1], [0, 0, 1, 1], [], []>} : vector<8x15xf32>, vector<15x32xf32>, vector<8x32xf32> -> vector<8x32xf32>
    %c0_3 = arith.constant 0 : index
    %c0_4 = arith.constant 0 : index
    %3 = vector.load %arg3[%c0_3, %c0_4] : memref<1x32xf32, #tpu.memory_space<vmem>>, vector<1x32xf32>
    %4 = vector.broadcast %3 : vector<1x32xf32> to vector<8x32xf32>
    %5 = arith.addf %2, %4 : vector<8x32xf32>
    %cst_5 = arith.constant 0.000000e+00 : f32
    %6 = vector.broadcast %cst_5 : f32 to vector<8x32xf32>
    %7 = arith.maximumf %5, %6 : vector<8x32xf32>
    %c0_6 = arith.constant 0 : index
    %c0_7 = arith.constant 0 : index
    %8 = vector.load %arg4[%c0_6, %c0_7] : memref<1x32xf32, #tpu.memory_space<vmem>>, vector<1x32xf32>
    %9 = vector.broadcast %8 : vector<1x32xf32> to vector<8x32xf32>
    %10 = arith.mulf %7, %9 : vector<8x32xf32>
    %cst_8 = arith.constant dense<0.000000e+00> : vector<8xf32>
    %11 = vector.multi_reduction <add>, %10, %cst_8 [1] : vector<8x32xf32> to vector<8xf32>
    %12 = vector.shape_cast %11 : vector<8xf32> to vector<8x1xf32>
    %c0_9 = arith.constant 0 : index
    %c0_10 = arith.constant 0 : index
    %13 = memref.load %arg5[%c0_9, %c0_10] : memref<1x1xf32, #tpu.memory_space<smem>>
    %14 = vector.broadcast %13 : f32 to vector<8x1xf32>
    %15 = arith.addf %12, %14 : vector<8x1xf32>
    %16 = arith.negf %15 : vector<8x1xf32>
    %17 = math.exp %16 : vector<8x1xf32>
    %cst_11 = arith.constant 1.000000e+00 : f32
    %18 = vector.broadcast %cst_11 : f32 to vector<8x1xf32>
    %19 = arith.addf %18, %17 : vector<8x1xf32>
    %20 = arith.divf %18, %19 : vector<8x1xf32>
    %c0_12 = arith.constant 0 : index
    %c0_13 = arith.constant 0 : index
    %21 = vector.load %arg6[%c0_12, %c0_13] : memref<8x1xf32, #tpu.memory_space<vmem>>, vector<8x1xf32>
    tpu.vector_store %arg6[%c0_12, %c0_13], %20 {strides = array<i32>} : memref<8x1xf32, #tpu.memory_space<vmem>>, vector<8x1xf32>,
    return
  }
  func.func @transform_0(%arg0: i32) -> (i32, i32) {
    %c0_i32 = arith.constant 0 : i32
    %c0_i32_0 = arith.constant 0 : i32
    return %arg0, %c0_i32 : i32, i32
  }
  func.func @transform_1(%arg0: i32) -> (i32, i32) {
    %c0_i32 = arith.constant 0 : i32
    %c0_i32_0 = arith.constant 0 : i32
    %c0_i32_1 = arith.constant 0 : i32
    return %c0_i32, %c0_i32_0 : i32, i32
  }
  func.func @transform_2(%arg0: i32) -> (i32, i32) {
    %c0_i32 = arith.constant 0 : i32
    %c0_i32_0 = arith.constant 0 : i32
    %c0_i32_1 = arith.constant 0 : i32
    return %c0_i32, %c0_i32_0 : i32, i32
  }
  func.func @transform_3(%arg0: i32) -> (i32, i32) {
    %c0_i32 = arith.constant 0 : i32
    %c0_i32_0 = arith.constant 0 : i32
    %c0_i32_1 = arith.constant 0 : i32
    return %c0_i32, %c0_i32_0 : i32, i32
  }
  func.func @transform_4(%arg0: i32) -> (i32, i32) {
    %c0_i32 = arith.constant 0 : i32
    %c0_i32_0 = arith.constant 0 : i32
    %c0_i32_1 = arith.constant 0 : i32
    return %c0_i32, %c0_i32_0 : i32, i32
  }
  func.func @transform_5(%arg0: i32) -> (i32, i32) {
    %c0_i32 = arith.constant 0 : i32
    %c0_i32_0 = arith.constant 0 : i32
    return %arg0, %c0_i32 : i32, i32
  }
}

</mosaic_0001>

<bundles_post_ra>
// kernel: tpu_custom_call.1
= control target key start
LH: loop header
LB: loop body
LE: loop exit
PB: predicated region body
PF: predicated region fallthrough
CT: control target
= control target key end

     0   :  { %11 = vsyncpa [#allocation4], 0  ;;  %s325_s0 = inlined_call_operand.hbm [shape: f32[8,15], index: 0, kind: input, shape index: {}]   ;;  %s326_s1 = inlined_call_operand.hbm [shape: f32[15,32], index: 1, kind: input, shape index: {}]   ;;  %s327_s2 = inlined_call_operand.vmem [shape: f32[1,32], index: 2, kind: input, shape index: {}]   ;;  %s328_s3 = inlined_call_operand.vmem [shape: f32[1,32], index: 3, kind: input, shape index: {}]   ;;  %s329_s4 = inlined_call_operand.<no memory space> [shape: f32[1,1], index: 4, kind: input, shape index: {}]   ;;  %s330_s5 = inlined_call_operand.vmem [shape: f32[8,1], index: 5, kind: output, shape index: {}]  }
   0x1   :  { %12 = vsyncpa [#allocation6], 0  ;;  %s244_s18 = smov [#allocation3]   ;;  %s245_s20 = smov [#allocation5]  }
   0x2   :  { %s19_s19 = sshll.u32 %s244_s18, 4  ;;  %s28_s21 = sshll.u32 %s245_s20, 4  ;;  %s20_s19 = int_to_ptr.vmem [resolvable:$true] %s19_s19  ;;  %s282_s21 = int_to_ptr.vmem [resolvable:$true] %s28_s21 }
   0x3   :  { %s196_s24 = scalar_lea.hbm %s325_s0, 128 }
   0x4   :  { %p197_p0 = scmp.ne.s32.totalorder %s325_s0, %s196_s24  ;;  %p200_p1 = scmp.lt.u32.totalorder %s196_s24, %s325_s0 }
   0x6   :  { %p202_p2 = pnand %p200_p1, %p197_p0 }
   0x8   :  { %205 = shalt.err (!%p202_p2)
}
   0x9   :  { %s206_s29 = scalar_lea.vmem %s20_s19, 128  ;;  %p211_p4 = scmp.lt.s32.totalorder %s20_s19, %s20_s19 }
   0xa   :  { %p207_p3 = scmp.ne.s32.totalorder %s20_s19, %s206_s29  ;;  %p212_p5 = scmp.lt.s32.totalorder %s206_s29, %s206_s29 }
   0xc   :  { %p213_p6 = por %p212_p5, %p211_p4 }
   0xe   :  { %p214_p7 = pnand %p213_p6, %p207_p3 }
  0x10   :  { %217 = shalt.err (!%p214_p7)
}
  0x11   :  { %22 = dma.hbm_to_vmem [thread:$0]  %s325_s0, 128, %s20_s19, [#allocation4]  }
  0x12   :  { %s218_s9 = scalar_lea.hbm %s326_s1, 256 }
  0x13   :  { %p219_p8 = scmp.ne.s32.totalorder %s326_s1, %s218_s9  ;;  %p222_p9 = scmp.lt.u32.totalorder %s218_s9, %s326_s1 }
  0x15   :  { %p224_p10 = pnand %p222_p9, %p219_p8 }
  0x17   :  { %227 = shalt.err (!%p224_p10)
}
  0x18   :  { %s228_s14 = scalar_lea.vmem %s282_s21, 256  ;;  %p233_p12 = scmp.lt.s32.totalorder %s282_s21, %s282_s21 }
  0x19   :  { %p229_p11 = scmp.ne.s32.totalorder %s282_s21, %s228_s14  ;;  %p234_p13 = scmp.lt.s32.totalorder %s228_s14, %s228_s14 }
  0x1b   :  { %p235_p0 = por %p234_p13, %p233_p12 }
  0x1d   :  { %p236_p1 = pnand %p235_p0, %p229_p11 }
  0x1f   :  { %239 = shalt.err (!%p236_p1)
}
  0x20   :  { %s246_s0 = smov 128   ;;  %s247_s15 = smov 8  }
  0x21   :  { %34 = dma.hbm_to_vmem [thread:$0]  %s326_s1, 256, %s282_s21, [#allocation6], %s246_s0, %s246_s0, %s247_s15  }
  0x22   :  { %240 = dma.done.wait [#allocation4], 128  }
  0x23   :  { %241 = vsyncadd [#allocation4], 4294967168 }
  0x24   :  { %242 = dma.done.wait [#allocation6], 256  }
  0x25   :  { %243 = vsyncadd [#allocation6], 4294967040  ;;  %v248_v0 = vmov 0.0|0.0   ;;  %vm249_vm0 = vmmov 0   ;;  %v250_v1 = vmov 0.0   ;;  %vm61_vm1 = vcmask 1046528  }
  0x26   :  { %180 = vmatprep.subr.bf16.mxu0 %v248_v0  ;;  %177 = vmatprep.mubr.msk.f32.mxu0 %vm249_vm0, %v250_v1  ;;  %v48_v2 = vld [vmem:[#allocation5] sm:$0xff]  ;;  %v49_v3 = vld [vmem:[#allocation5 + $0x8] sm:$0x7f]  ;;  %vm251_vm2 = vmmov 1   ;;  %v47_v5 = vld [vmem:[#allocation3] sm:$0xff]  ;;  %vm57_vm4 = vcmask 121856   ;;  %v149_v14 = vstv %s329_s4 }
  0x27   :  { %vm182_vm3 = vmpackc.low %vm61_vm1, %vm251_vm2  ;;  %v181_v4 = vpack.c.bf16 %v49_v3, %v48_v2  ;;  %v165_v6 = vld [vmem:[%s327_s2] ss:$0 sm:$0xff]  ;;  %vm144_vm5 = vcmask 261120   ;;  %vm157_vm6 = vcmask 7168  }
  0x28   :  { %v168_v10 = vld [vmem:[%s328_s3] ss:$0 sm:$0xff] }
  0x29   :  { %183 = vmatpush3.bf16.msk.msra.mxu0 %vm182_vm3, %v181_v4 }
  0x2c   :  { %178 = vmatmul.mubr.msk.f32.vlgmr.msra.gmra.mrb[0].mxu0 %vm57_vm4, %v47_v5 }
  0xff   :  { %v131_v7 = vpop.f32.mrb[0].mxu0 }
 0x100   :  { %v132_v8 = vadd.f32 %v165_v6, %v131_v7  ;;  %v179_v9 = vpop.f32.mrb[1].mxu0 }
 0x102   :  { %v135_v11 = vmax.f32 %v132_v8, 0.0 }
 0x104   :  { %v143_v12 = vmul.f32 %v168_v10, %v135_v11 }
 0x106   :  { %v145_v13 = vsel %vm144_vm5, %v143_v12, 0.0 }
 0x107   :  { %146 = vadd.xlane.f32.xlu0 %v145_v13 }
 0x194   :  { %v147_v15 = vpop.xlane.xlu0 %146 }
 0x195   :  { %v150_v16 = vadd.f32 %v149_v14, %v147_v15 }
 0x197   :  { %v169_v17 = vmul.f32 -1.442695, %v150_v16 }
 0x199   :  { %192 = vpow2.f32 %v169_v17 }
 0x1a3   :  { %v193_v18 = vpop.eup %192 }
 0x1a4   :  { %v154_v19 = vadd.f32 1.0, %v193_v18 }
 0x1a6   :  { %194 = vrcp.f32 %v154_v19 }
 0x1b0   :  { %v195_v20 = vpop.eup %194 }
 0x1b1   :  { %158 = vst.msk [vmem:[%s330_s5] sm:$0xff] %vm157_vm6, %v195_v20 }
 0x1b2   :  { %163 = vsyncpa [#allocation4], 1 }
 0x1b3   :  { %164 = vsyncpa [#allocation6], 1 }

</bundles_post_ra>
